<compile_context>
chip_gen: v5e
topology: v5e:2x2
jax: 0.10.0
libtpu: 0.0.40
codegen_flags: <defaults>
</compile_context>

<pallas_src>
import functools

import jax
import jax.numpy as jnp
from jax import lax
from jax.experimental import pallas as pl
from jax.experimental.pallas import tpu as pltpu


def _round_up(x, m):
    return ((x + m - 1) // m) * m


def _embed_kernel(tok_idx_ref, tok_tab_ref, pos_blk_ref, o_ref, *, use_onehot):
    # tok_idx_ref: (1, 1, tq) int32 token ids for this (batch, chunk).
    # tok_tab_ref: (V, D_pad) token table, VMEM-resident across the whole grid.
    # pos_blk_ref: (tq, D_pad) positional rows for this chunk (pipelined input).
    # o_ref:       (1, tq, D_pad) output slab (sublane/lane dense).
    v = tok_tab_ref.shape[0]
    tq = o_ref.shape[1]

    if use_onehot:
        # Gather as a one-hot matmul on the MXU (exact with 0/1 weights, f32 acc).
        tok_row = tok_idx_ref[0]  # (1, tq) -- broadcast over sublanes below
        oh_t = (lax.broadcasted_iota(jnp.int32, (v, tq), 0) == tok_row).astype(
            tok_tab_ref.dtype
        )  # (V, tq) transposed one-hot
        tok_e = lax.dot_general(
            oh_t, tok_tab_ref[...], (((0,), (0,)), ((), ())),
            preferred_element_type=jnp.float32,
        )  # (tq, D_pad)
    else:
        # True gather on the resident table (no O(V) FLOPs or temporaries).
        ids = jnp.clip(tok_idx_ref[0, 0, :], 0, v - 1)  # guard OOB ids
        tok_e = jnp.take(tok_tab_ref[...], ids, axis=0).astype(jnp.float32)

    o_ref[0] = (tok_e + pos_blk_ref[...].astype(jnp.float32)).astype(o_ref.dtype)


def token_embedding_forward(embedding_idx, token_table, pos_table, *,
                            max_tq=512, onehot_max_vocab=2048):
    """embedding_idx: [B, T] int; token_table: [V, D]; pos_table: [S, D], S >= T.

    Returns [B, T, D] in token_table.dtype (dropout p=0.0 -> identity).
    """
    B, T = embedding_idx.shape
    V, D = token_table.shape
    S, D2 = pos_table.shape
    assert D == D2, "token and positional embedding dims must match"
    assert T <= S, "token_length must not exceed positional capacity"

    out_dtype = token_table.dtype
    itemsize = jnp.dtype(out_dtype).itemsize

    # Lane-dense output: pad embedding dim to a multiple of 128 (unmasked vst),
    # slice the padding back off outside the kernel.
    D_pad = _round_up(D, 128)
    if D_pad != D:
        token_table = jnp.pad(token_table, ((0, 0), (0, D_pad - D)))
        pos_table = jnp.pad(pos_table, ((0, 0), (0, D_pad - D)))
    pos_used = pos_table[:T]  # only the rows this forward actually reads

    # Chunk size along T.  tq == T keeps every block a full-extent block (no (8,128)
    # divisibility issue and no tail); for long sequences use 512 (multiple of 256 =
    # MXU M on v6e/v7x, multiple of 128 for v5e and for the id block's lane dim).
    tq = T if T <= max_tq else 512
    n_chunks = pl.cdiv(T, tq)

    tok_ids = embedding_idx.astype(jnp.int32).reshape(B, 1, T)

    use_onehot = V <= onehot_max_vocab
    kernel = functools.partial(_embed_kernel, use_onehot=use_onehot)

    try:
        phys_vmem = pltpu.get_tpu_info().vmem_capacity_bytes
    except Exception:
        phys_vmem = 64 << 20  # conservative: v7x per-TensorCore VMEM
    vmem_cap = (7 * phys_vmem) // 8

    def run(table_buffers):
        if table_buffers == 1:
            # Constant index_map -> single buffer halves the resident-table footprint.
            table_spec = pl.BlockSpec((V, D_pad), lambda b, t: (0, 0),
                                      pipeline_mode=pl.Buffered(1))
        else:
            table_spec = pl.BlockSpec((V, D_pad), lambda b, t: (0, 0))

        # Size scoped VMEM from the real footprint (defaults are 16/32/32 MiB).
        needed = (
            table_buffers * V * D_pad * itemsize              # resident token table
            + 2 * tq * D_pad * itemsize                        # pos rows (dbl-buffered)
            + 2 * tq * D_pad * itemsize                        # output slab (dbl-buffered)
            + 2 * tq * 4                                       # id block
            + (V * tq * itemsize + tq * D_pad * 4 if use_onehot else 0)
        )
        vmem_limit = int(min(max(2 * needed, 32 << 20), vmem_cap))

        grid_spec = pltpu.PrefetchScalarGridSpec(
            num_scalar_prefetch=0,
            grid=(B, n_chunks),
            in_specs=[
                pl.BlockSpec((1, 1, tq), lambda b, t: (b, 0, t)),   # token ids chunk
                table_spec,                                          # token table (resident)
                pl.BlockSpec((tq, D_pad), lambda b, t: (t, 0)),      # positional rows
            ],
            out_specs=pl.BlockSpec((1, tq, D_pad), lambda b, t: (b, t, 0)),
        )
        return pl.pallas_call(
            kernel,
            out_shape=jax.ShapeDtypeStruct((B, T, D_pad), out_dtype),
            grid_spec=grid_spec,
            compiler_params=pltpu.CompilerParams(
                # Both grid axes are independent -> v7x shards the B * n_chunks
                # steps across its two TensorCores.
                dimension_semantics=("parallel", "parallel"),
                vmem_limit_bytes=vmem_limit,
            ),
        )(tok_ids, token_table, pos_used)

    try:
        out = run(1)   # single-buffered resident table (v7x VMEM headroom)
    except Exception:
        out = run(2)   # fall back if pipeline_mode / Buffered(1) is unavailable

    return out if D_pad == D else out[..., :D]


if __name__ == "__main__":
    # Module hyper-parameters (small, consistent with the PyTorch forward).
    vocab_size = 64
    pad_idx = 0
    seq_length = 16   # capacity of pos_embedding
    d_model = 32
    B, T = 2, 8       # token_length T <= seq_length

    key = jax.random.PRNGKey(0)
    k_tok, k_pos, k_idx = jax.random.split(key, 3)

    # nn.Embedding default init: N(0, 1); padding_idx row zeroed.
    token_table = jax.random.normal(k_tok, (vocab_size, d_model), dtype=jnp.float32)
    token_table = token_table.at[pad_idx].set(0.0)
    pos_table = jax.random.normal(k_pos, (seq_length, d_model), dtype=jnp.float32)

    embedding_idx = jax.random.randint(k_idx, (B, T), 0, vocab_size, dtype=jnp.int32)
    embedding_idx = embedding_idx.at[0, 0].set(pad_idx)  # exercise padding_idx

    out = token_embedding_forward(embedding_idx, token_table, pos_table)
    out = jax.block_until_ready(out)

    # Pure-JAX reference (dropout p=0.0 is identity).
    ref = token_table[embedding_idx] + pos_table[:T][None, :, :]
    assert out.shape == (B, T, d_model)
    assert jnp.allclose(out, ref, atol=1e-6), "mismatch vs reference"

    print("KERNEL_OK")
</pallas_src>

<mosaic_0001>
module attributes {stable_mosaic.version = 11 : i64} {
  func.func @_embed_kernel(%arg0: i32, %arg1: i32, %arg2: memref<1x1x8xi32, #tpu.memory_space<vmem>>, %arg3: memref<64x128xf32, #tpu.memory_space<vmem>>, %arg4: memref<8x128xf32, #tpu.memory_space<vmem>>, %arg5: memref<1x8x128xf32, #tpu.memory_space<vmem>>) attributes {dimension_semantics = [#tpu.dimension_semantics<parallel>, #tpu.dimension_semantics<parallel>], iteration_bounds = array<i64: 2, 1>, scalar_prefetch = 0 : i64, scratch_operands = 0 : i64, tpu.core_type = #tpu.core_type<tc>, window_params = [{transform_indices = @transform_0, window_bounds = array<i64: 1, 1, 8>}, {pipeline_mode = #tpu.pipeline_mode<synchronous>, transform_indices = @transform_1, window_bounds = array<i64: 64, 128>}, {transform_indices = @transform_2, window_bounds = array<i64: 8, 128>}, {transform_indices = @transform_3, window_bounds = array<i64: 1, 8, 128>}]} {
    %c0 = arith.constant 0 : index
    %c0_0 = arith.constant 0 : index
    %c0_1 = arith.constant 0 : index
    %0 = vector.load %arg2[%c0, %c0_0, %c0_1] : memref<1x1x8xi32, #tpu.memory_space<vmem>>, vector<1x1x8xi32>
    %1 = vector.shape_cast %0 : vector<1x1x8xi32> to vector<1x8xi32>
    %2 = tpu.iota {dimensions = array<i32: 0>} : vector<64x8xi32>
    %3 = vector.broadcast %1 : vector<1x8xi32> to vector<64x8xi32>
    %4 = arith.cmpi eq, %2, %3 : vector<64x8xi32>
    %5 = arith.extui %4 : vector<64x8xi1> to vector<64x8xi32>
    %6 = arith.sitofp %5 : vector<64x8xi32> to vector<64x8xf32>
    %c0_2 = arith.constant 0 : index
    %c0_3 = arith.constant 0 : index
    %7 = vector.load %arg3[%c0_2, %c0_3] : memref<64x128xf32, #tpu.memory_space<vmem>>, vector<64x128xf32>
    %cst = arith.constant dense<0.000000e+00> : vector<8x128xf32>
    %8 = tpu.matmul %6, %7, %cst {dimension_numbers = #tpu.dot_dimension_numbers<[0], [0], [1], [1], [0, 1, 1, 1], [], []>} : vector<64x8xf32>, vector<64x128xf32>, vector<8x128xf32> -> vector<8x128xf32>
    %c0_4 = arith.constant 0 : index
    %c0_5 = arith.constant 0 : index
    %9 = vector.load %arg4[%c0_4, %c0_5] : memref<8x128xf32, #tpu.memory_space<vmem>>, vector<8x128xf32>
    %10 = arith.addf %8, %9 : vector<8x128xf32>
    %c0_6 = arith.constant 0 : index
    %c0_7 = arith.constant 0 : index
    %c0_8 = arith.constant 0 : index
    %11 = vector.load %arg5[%c0_6, %c0_7, %c0_8] : memref<1x8x128xf32, #tpu.memory_space<vmem>>, vector<1x8x128xf32>
    %12 = vector.shape_cast %11 : vector<1x8x128xf32> to vector<8x128xf32>
    %13 = vector.shape_cast %10 : vector<8x128xf32> to vector<1x8x128xf32>
    tpu.vector_store %arg5[%c0_6, %c0_7, %c0_8], %13 {strides = array<i32>} : memref<1x8x128xf32, #tpu.memory_space<vmem>>, vector<1x8x128xf32>,
    return
  }
  func.func @transform_0(%arg0: i32, %arg1: i32) -> (i32, i32, i32) {
    %c0_i32 = arith.constant 0 : i32
    %c0_i32_0 = arith.constant 0 : i32
    return %arg0, %c0_i32, %arg1 : i32, i32, i32
  }
  func.func @transform_1(%arg0: i32, %arg1: i32) -> (i32, i32) {
    %c0_i32 = arith.constant 0 : i32
    %c0_i32_0 = arith.constant 0 : i32
    %c0_i32_1 = arith.constant 0 : i32
    return %c0_i32, %c0_i32_0 : i32, i32
  }
  func.func @transform_2(%arg0: i32, %arg1: i32) -> (i32, i32) {
    %c0_i32 = arith.constant 0 : i32
    %c0_i32_0 = arith.constant 0 : i32
    return %arg1, %c0_i32 : i32, i32
  }
  func.func @transform_3(%arg0: i32, %arg1: i32) -> (i32, i32, i32) {
    %c0_i32 = arith.constant 0 : i32
    %c0_i32_0 = arith.constant 0 : i32
    return %arg0, %arg1, %c0_i32 : i32, i32, i32
  }
}

module attributes {stable_mosaic.version = 11 : i64} {
  func.func @_embed_kernel(%arg0: i32, %arg1: i32, %arg2: memref<1x1x8xi32, #tpu.memory_space<vmem>>, %arg3: memref<64x128xf32, #tpu.memory_space<vmem>>, %arg4: memref<8x128xf32, #tpu.memory_space<vmem>>, %arg5: memref<1x8x128xf32, #tpu.memory_space<vmem>>) attributes {dimension_semantics = [#tpu.dimension_semantics<parallel>, #tpu.dimension_semantics<parallel>], iteration_bounds = array<i64: 2, 1>, scalar_prefetch = 0 : i64, scratch_operands = 0 : i64, tpu.core_type = #tpu.core_type<tc>, window_params = [{transform_indices = @transform_0, window_bounds = array<i64: 1, 1, 8>}, {pipeline_mode = #tpu.pipeline_mode<synchronous>, transform_indices = @transform_1, window_bounds = array<i64: 64, 128>}, {transform_indices = @transform_2, window_bounds = array<i64: 8, 128>}, {transform_indices = @transform_3, window_bounds = array<i64: 1, 8, 128>}]} {
    %c0 = arith.constant 0 : index
    %c0_0 = arith.constant 0 : index
    %c0_1 = arith.constant 0 : index
    %0 = vector.load %arg2[%c0, %c0_0, %c0_1] : memref<1x1x8xi32, #tpu.memory_space<vmem>>, vector<1x1x8xi32>
    %1 = vector.shape_cast %0 : vector<1x1x8xi32> to vector<1x8xi32>
    %2 = tpu.iota {dimensions = array<i32: 0>} : vector<64x8xi32>
    %3 = vector.broadcast %1 : vector<1x8xi32> to vector<64x8xi32>
    %4 = arith.cmpi eq, %2, %3 : vector<64x8xi32>
    %5 = arith.extui %4 : vector<64x8xi1> to vector<64x8xi32>
    %6 = arith.sitofp %5 : vector<64x8xi32> to vector<64x8xf32>
    %c0_2 = arith.constant 0 : index
    %c0_3 = arith.constant 0 : index
    %7 = vector.load %arg3[%c0_2, %c0_3] : memref<64x128xf32, #tpu.memory_space<vmem>>, vector<64x128xf32>
    %cst = arith.constant dense<0.000000e+00> : vector<8x128xf32>
    %8 = tpu.matmul %6, %7, %cst {dimension_numbers = #tpu.dot_dimension_numbers<[0], [0], [1], [1], [0, 1, 1, 1], [], []>} : vector<64x8xf32>, vector<64x128xf32>, vector<8x128xf32> -> vector<8x128xf32>
    %c0_4 = arith.constant 0 : index
    %c0_5 = arith.constant 0 : index
    %9 = vector.load %arg4[%c0_4, %c0_5] : memref<8x128xf32, #tpu.memory_space<vmem>>, vector<8x128xf32>
    %10 = arith.addf %8, %9 : vector<8x128xf32>
    %c0_6 = arith.constant 0 : index
    %c0_7 = arith.constant 0 : index
    %c0_8 = arith.constant 0 : index
    %11 = vector.load %arg5[%c0_6, %c0_7, %c0_8] : memref<1x8x128xf32, #tpu.memory_space<vmem>>, vector<1x8x128xf32>
    %12 = vector.shape_cast %11 : vector<1x8x128xf32> to vector<8x128xf32>
    %13 = vector.shape_cast %10 : vector<8x128xf32> to vector<1x8x128xf32>
    tpu.vector_store %arg5[%c0_6, %c0_7, %c0_8], %13 {strides = array<i32>} : memref<1x8x128xf32, #tpu.memory_space<vmem>>, vector<1x8x128xf32>,
    return
  }
  func.func @transform_0(%arg0: i32, %arg1: i32) -> (i32, i32, i32) {
    %c0_i32 = arith.constant 0 : i32
    %c0_i32_0 = arith.constant 0 : i32
    return %arg0, %c0_i32, %arg1 : i32, i32, i32
  }
  func.func @transform_1(%arg0: i32, %arg1: i32) -> (i32, i32) {
    %c0_i32 = arith.constant 0 : i32
    %c0_i32_0 = arith.constant 0 : i32
    %c0_i32_1 = arith.constant 0 : i32
    return %c0_i32, %c0_i32_0 : i32, i32
  }
  func.func @transform_2(%arg0: i32, %arg1: i32) -> (i32, i32) {
    %c0_i32 = arith.constant 0 : i32
    %c0_i32_0 = arith.constant 0 : i32
    return %arg1, %c0_i32 : i32, i32
  }
  func.func @transform_3(%arg0: i32, %arg1: i32) -> (i32, i32, i32) {
    %c0_i32 = arith.constant 0 : i32
    %c0_i32_0 = arith.constant 0 : i32
    return %arg0, %arg1, %c0_i32 : i32, i32, i32
  }
}

</mosaic_0001>

<bundles_post_ra>
// kernel: tpu_custom_call.1
= control target key start
LH: loop header
LB: loop body
LE: loop exit
PB: predicated region body
PF: predicated region fallthrough
CT: control target
= control target key end

     0   :  { %8 = vsyncpa [#allocation3], 0  ;;  %s918_s0 = inlined_call_operand.hbm [shape: s32[2,1,8], index: 0, kind: input, shape index: {}]   ;;  %s919_s1 = inlined_call_operand.hbm [shape: f32[64,128], index: 1, kind: input, shape index: {}]   ;;  %s920_s2 = inlined_call_operand.hbm [shape: f32[8,128], index: 2, kind: input, shape index: {}]   ;;  %s921_s3 = inlined_call_operand.hbm [shape: f32[2,8,128], index: 3, kind: output, shape index: {}]  }
   0x1   :  { %10 = vsyncpa [#allocation3 + $0x1], 0 }
   0x2   :  { %11 = vsyncpa [#allocation6], 0 }
   0x3   :  { %12 = vsyncpa [#allocation4], 0 }
   0x4   :  { %14 = vsyncpa [#allocation4 + $0x1], 0  ;;  %s767_s12 = smov 0   ;;  %s769_s13 = smov 0  }
   0x5   :  { %s771_s14 = smov 0   ;;  %s773_s15 = smov 0  }
   0x6   :  { %s775_s16 = smov 0   ;;  %s777_s17 = smov 0  }
   0x7 LB: > { %s454_s18 = sadd.s32 4294967295, %s740_s17   ;;  %p456_p0 = scmp.ge.s32.totalorder %s740_s17, 1  ;;  %s740_s17 = sphi %s777_s17, %s20_s17   ;;  %s736_s16 = sphi %s775_s16, %s932_s16   ;;  %s732_s15 = sphi %s773_s15, %s931_s15   ;;  %s728_s14 = sphi %s771_s14, %s930_s14   ;;  %s724_s13 = sphi %s769_s13, %s929_s13   ;;  %s720_s12 = sphi %s767_s12, %s928_s12  }
   0x8   : > { %p801_p1 = scmp.eq.s32.totalorder %s454_s18, 0  ;;  %p140_p2 = scmp.lt.s32.totalorder %s740_s17, 3 }
   0x9   : > { %s151_s22 = sshll.u32 %s919_s1, 4  ;;  %s742_s24 = smov [#allocation5]   ;;  %s152_s22 = int_to_ptr.hbm [resolvable:$true] %s151_s22 }
   0xa   : > { %p809_p3 = pnand %p456_p0, %p140_p2  ;;  %s153_s25 = sshll.u32 %s742_s24, 4  ;;  %s154_s25 = int_to_ptr.vmem [resolvable:$true] %s153_s25 }
   0xb   : > { %p459_p6 = scmp.ge.s32.totalorder %s740_s17, 2  ;;  %s168_s28 = sshll.u32 %s920_s2, 4  ;;  %s169_s28 = int_to_ptr.hbm [resolvable:$true] %s168_s28 }
   0xc   : > { %p489_p4 = pneg %p809_p3  ;;  %s743_s29 = smov 128  }
   0xd   : > { %s744_s30 = smov 8   ;;  %s745_s4 = smov [#allocation7]  }
   0xe   : > { %p490_p5 = pnand %p489_p4, %p801_p1  ;;  %s170_s5 = sshll.u32 %s745_s4, 4  ;;  %s171_s5 = int_to_ptr.vmem [resolvable:$true] %s170_s5 }
   0xf   : > { %s455_s6 = sadd.s32 4294967294, %s740_s17   ;;  %s32_s7 = sadd.s32 1, %s736_s16 }
  0x10   : > { %492 = dma.hbm_to_vmem [thread:$0]  (!%p490_p5), %s152_s22, 1024, %s154_s25, [#allocation6], %s743_s29, %s743_s29, %s744_s30  }
  0x11   : > { %495 = dma.hbm_to_vmem [thread:$0]  (!%p490_p5), %s169_s28, 128, %s171_s5, [#allocation6]  }
  0x12   : > { %p34_p7 = scmp.ge.s32.totalorder %s32_s7, 2  ;;  %s41_s8 = sadd.s32 1, %s728_s14 }
  0x13   : > { %p48_p8 = scmp.ne.s32.totalorder %s728_s14, %s724_s13  ;;  %p49_p9 = scmp.eq.s32.totalorder %s740_s17, 0 }
  0x14   : > { %s934_s7 = smov (%p34_p7, %s32_s7), 0  ;;  %p54_p11 = scmp.ne.s32.totalorder %s724_s13, %s720_s12 }
  0x15   : > { %p829_p10 = por %p49_p9, %p48_p8  ;;  %s36_s10 = ssub.s32 %s736_s16, %s934_s7 }
  0x16   : > { %p127_p12 = scmp.eq.s32.totalorder %s454_s18, 1  ;;  %p39_p13 = scmp.eq.s32.totalorder %s36_s10, 0 }
  0x17   : > { %p841_p0 = por %p801_p1, %p54_p11  ;;  %p133_p4 = scmp.eq.s32.totalorder %s455_s6, 1 }
  0x18   : > { %p845_p2 = por %p127_p12, %p48_p8  ;;  %p506_p7 = scmp.lt.s32.totalorder %s740_s17, 2 }
  0x19   : > { %s850_s21 = scalar_select %p39_p13, %s728_s14, %s41_s8  }
  0x1a   : > { %p852_p5 = por %p133_p4, %p54_p11  ;;  %s181_s24 = sand.u32 1, %s728_s14  }
  0x1b   : > { %s188_s26 = scalar_lea.hbm %s918_s0, %s736_s16  ;;  %s184_s28 = scalar_lea.vmem [#allocation2], %s181_s24 }
  0x1c   : > { %s190_s27 = sshll.u32 %s188_s26, 4  ;;  %s192_s29 = sshll.u32 %s184_s28, 4  ;;  %s191_s27 = int_to_ptr.hbm [resolvable:$true] %s190_s27  ;;  %s193_s29 = int_to_ptr.vmem [resolvable:$true] %s192_s29 }
  0x1d   : > { %p497_p8 = pnand %p506_p7, %p829_p10  ;;  %s182_s30 = scalar_lea.sflag [#allocation3], %s181_s24 }
  0x1e   : > { %201 = sbr.rel (%p809_p3) target bundleno = 340 (0x154), region = 32  ;;  %s867_s4 = sand.u32 (!%p809_p3), 1, %s724_s13  }
  0x1f   : > { %499 = dma.hbm_to_vmem [thread:$0]  (!%p497_p8), %s191_s27, 16, %s193_s29, %s182_s30  }
  0x20   : > { %s204_s5 = scalar_lea.sflag (!%p809_p3), [#allocation3], %s867_s4  ;;  %s206_s6 = scalar_lea.vmem (!%p809_p3), [#allocation2], %s867_s4 }
  0x23   : > { %707 = dma.done.wait (%p841_p0), %s204_s5, 16  }
  0x24   : > { %709 = vsyncadd (%p841_p0), %s204_s5, 4294967280 }
  0x25   : > { %711 = dma.done.wait (%p801_p1), [#allocation6], 1152  }
  0x26   : > { %713 = vsyncadd (%p801_p1), [#allocation6], 4294966144  ;;  %v240_v0 = vlaneseq  ;;  %v563_v2 = vld [vmem:[%s206_s6] ss:$0 sm:$0xff]  ;;  %v746_v4 = vmov 0.0   ;;  %v280_v13 = vld [vmem:[#allocation5 + $0x30] sm:$0xff] }
  0x27   : > { %v281_v12 = vld [vmem:[#allocation5 + $0x38] sm:$0xff]  ;;  %v279_v14 = vld [vmem:[#allocation5 + $0x28] sm:$0xff]  ;;  %v278_v15 = vld [vmem:[#allocation5 + $0x20] sm:$0xff]  ;;  %vm315_vm8 = vcmask 523264   ;;  %s463_s19 = sshll.u32 %s867_s4, 3  ;;  %s474_s23 = sshll.u32 %s732_s15, 3 }
  0x28   : > { %v241_v1 = vshrl.u32 %v240_v0, 7  ;;  %327 = vmatpush.msra.mxu0 %v281_v12  ;;  %v277_v18 = vld [vmem:[#allocation5 + $0x18] sm:$0xff]  ;;  %v276_v19 = vld [vmem:[#allocation5 + $0x10] sm:$0xff]  ;;  %v275_v20 = vld [vmem:[#allocation5 + $0x8] sm:$0xff]  ;;  %s352_s10 = scalar_lea.hbm %s921_s3, %s474_s23  ;;  %s238_s11 = scalar_lea.vmem [#allocation8], %s463_s19 }
  0x29   : > { %v274_v21 = vld [vmem:[#allocation5] sm:$0xff]  ;;  %s354_s24 = sshll.u32 %s238_s11, 4  ;;  %s356_s18 = sshll.u32 %s352_s10, 4  ;;  %s355_s24 = int_to_ptr.vmem [resolvable:$true] %s354_s24  ;;  %s357_s18 = int_to_ptr.hbm [resolvable:$true] %s356_s18 }
  0x2a   : > { %vm250_vm0 = vcmp.eq.s32.totalorder %v241_v1, %v563_v2  ;;  %v242_v3 = vadd.s32 8, %v241_v1  ;;  %v243_v7 = vadd.s32 16, %v241_v1  ;;  %v244_v9 = vadd.s32 24, %v241_v1  ;;  %328 = vmatpush.msra.mxu0 %v280_v13  ;;  %v282_v28 = vld [vmem:[#allocation7] sm:$0xff]  ;;  %s341_s25 = scalar_lea.sflag [#allocation4], %s867_s4  ;;  %s668_s26 = sshra.s32 %s357_s18, 4  ;;  %s669_s26 = int_to_ptr.hbm [resolvable:$true] %s668_s26 }
  0x2b   : > { %v464_v5 = vsel %vm250_vm0, 1.0, %v746_v4  ;;  %v245_v11 = vadd.s32 32, %v241_v1  ;;  %v246_v17 = vadd.s32 40, %v241_v1  ;;  %v247_v23 = vadd.s32 48, %v241_v1  ;;  %s670_s27 = scalar_lea.hbm %s669_s26, 8  ;;  %s674_s29 = scalar_lea.hbm %s921_s3, 16 }
  0x2c   : > { %283 = vxpose.xlu0.b32.start [1/8] (short) (narrow) %v464_v5, 8  ;;  %vm251_vm1 = vcmp.eq.s32.totalorder %v242_v3, %v563_v2  ;;  %vm252_vm2 = vcmp.eq.s32.totalorder %v243_v7, %v563_v2  ;;  %vm253_vm3 = vcmp.eq.s32.totalorder %v244_v9, %v563_v2  ;;  %329 = vmatpush.msra.mxu0 %v279_v14  ;;  %v248_v25 = vadd.s32 56, %v241_v1  ;;  %p671_p1 = scmp.ne.s32.totalorder %s669_s26, %s670_s27  ;;  %p675_p10 = scmp.lt.s32.totalorder %s669_s26, %s921_s3 }
  0x2d   : > { %v465_v6 = vsel %vm251_vm1, 1.0, %v746_v4  ;;  %v466_v8 = vsel %vm252_vm2, 1.0, %v746_v4  ;;  %v467_v10 = vsel %vm253_vm3, 1.0, %v746_v4  ;;  %vm254_vm4 = vcmp.eq.s32.totalorder %v245_v11, %v563_v2  ;;  %p676_p11 = scmp.lt.s32.totalorder %s674_s29, %s670_s27 }
  0x2e   : > { %v468_v16 = vsel %vm254_vm4, 1.0, %v746_v4  ;;  %330 = vmatpush.msra.mxu0 %v278_v15  ;;  %vm255_vm5 = vcmp.eq.s32.totalorder %v246_v17, %v563_v2  ;;  %vm256_vm6 = vcmp.eq.s32.totalorder %v247_v23, %v563_v2  ;;  %vm257_vm7 = vcmp.eq.s32.totalorder %v248_v25, %v563_v2  ;;  %p672_p3 = pnand %p671_p1, %p845_p2 }
  0x2f   : > { %v469_v22 = vsel %vm255_vm5, 1.0, %v746_v4  ;;  %v470_v24 = vsel %vm256_vm6, 1.0, %v746_v4  ;;  %v471_v26 = vsel %vm257_vm7, 1.0, %v746_v4  ;;  %p677_p12 = por %p676_p11, %p675_p10 }
  0x30   : > { %331 = vmatpush.msra.mxu0 %v277_v18  ;;  %p673_p9 = pneg %p672_p3 }
  0x32   : > { %332 = vmatpush.msra.mxu0 %v276_v19  ;;  %p678_p13 = pnand %p677_p12, %p673_p9 }
  0x34   : > { %284 = vxpose.xlu0.b32.cont [2/8] (short) (narrow) %v465_v6, 8  ;;  %333 = vmatpush.msra.mxu0 %v275_v20 }
  0x36   : > { %334 = vmatpush.msra.mxu0 %v274_v21 }
  0x3c   : > { %285 = vxpose.xlu0.b32.cont [3/8] (short) (narrow) %v466_v8, 8 }
  0x44   : > { %286 = vxpose.xlu0.b32.cont [4/8] (short) (narrow) %v467_v10, 8 }
  0x4c   : > { %287 = vxpose.xlu0.b32.cont [5/8] (short) (narrow) %v468_v16, 8 }
  0x54   : > { %288 = vxpose.xlu0.b32.cont [6/8] (short) (narrow) %v469_v22, 8 }
  0x5c   : > { %289 = vxpose.xlu0.b32.cont [7/8] (short) (narrow) %v470_v24, 8 }
  0x64   : > { %290 = vxpose.xlu0.b32.end [8/8] (short) (narrow) %v471_v26, 8 }
  0xd0   : > { %v299_v27 = vpop.trf.xlu0 }
  0xd1   : > { %472 = vmatmul.msk.f32.vlgmr.msra.gmra.mxu0 %vm315_vm8, %v299_v27 }
 0x14e   : > { %v336_v29 = vpop.f32.mrf.mxu0 }
 0x14f   : > { %v337_v30 = vadd.f32 %v336_v29, %v282_v28 }
 0x151   : > { %339 = vst [vmem:[%s238_s11] sm:$0xff] %v337_v30 }
 0x152   : > { %681 = shalt.err (!%p678_p13)
}
 0x153   : > { %487 = dma.vmem_to_hbm [thread:$0]  (%p845_p2), %s355_s24, 128, %s357_s18, %s341_s25  }
 0x154 PF: > { %s368_s4 = sand.u32 1, %s720_s12   ;;  %p501_p0 = pnand %p459_p6, %p852_p5 }
 0x155   : > { %s369_s6 = scalar_lea.sflag [#allocation4], %s368_s4 }
 0x156   : > { %p502_p4 = pneg %p501_p0 }
 0x158   : > { %715 = dma.done.wait (%p502_p4), %s369_s6, 128  }
 0x159   : > { %717 = vsyncadd (%p502_p4), %s369_s6, 4294967168  ;;  %s20_s17 = sadd.s32 1, %s740_s17   ;;  %s928_s12 = smov %s724_s13 }
 0x15a   : > { %p17_p7 = scmp.ge.s32.totalorder %s20_s17, 4   ;;  %s929_s13 = smov %s728_s14 }
 0x15b   : > { %s930_s14 = smov %s850_s21  ;;  %s931_s15 = smov %s736_s16 }
 0x15c   : > { %s932_s16 = smov %s934_s7  ;;  %19 = sbr.rel (!%p17_p7) target bundleno = 7 (0x7), region = 86 }
 0x161   :  { %375 = vsyncpa [#allocation3], 1 }
 0x162   :  { %377 = vsyncpa [#allocation3 + $0x1], 1 }
 0x163   :  { %378 = vsyncpa [#allocation6], 1 }
 0x164   :  { %379 = vsyncpa [#allocation4], 1 }
 0x165   :  { %381 = vsyncpa [#allocation4 + $0x1], 1 }

// kernel: tpu_custom_call.1
= control target key start
LH: loop header
LB: loop body
LE: loop exit
PB: predicated region body
PF: predicated region fallthrough
CT: control target
= control target key end

     0   :  { %8 = vsyncpa [#allocation3], 0  ;;  %s918_s0 = inlined_call_operand.hbm [shape: s32[2,1,8], index: 0, kind: input, shape index: {}]   ;;  %s919_s1 = inlined_call_operand.hbm [shape: f32[64,128], index: 1, kind: input, shape index: {}]   ;;  %s920_s2 = inlined_call_operand.hbm [shape: f32[8,128], index: 2, kind: input, shape index: {}]   ;;  %s921_s3 = inlined_call_operand.hbm [shape: f32[2,8,128], index: 3, kind: output, shape index: {}]  }
   0x1   :  { %10 = vsyncpa [#allocation3 + $0x1], 0 }
   0x2   :  { %11 = vsyncpa [#allocation6], 0 }
   0x3   :  { %12 = vsyncpa [#allocation4], 0 }
   0x4   :  { %14 = vsyncpa [#allocation4 + $0x1], 0  ;;  %s767_s12 = smov 0   ;;  %s769_s13 = smov 0  }
   0x5   :  { %s771_s14 = smov 0   ;;  %s773_s15 = smov 0  }
   0x6   :  { %s775_s16 = smov 0   ;;  %s777_s17 = smov 0  }
   0x7 LB: > { %s454_s18 = sadd.s32 4294967295, %s740_s17   ;;  %p456_p0 = scmp.ge.s32.totalorder %s740_s17, 1  ;;  %s740_s17 = sphi %s777_s17, %s20_s17   ;;  %s736_s16 = sphi %s775_s16, %s932_s16   ;;  %s732_s15 = sphi %s773_s15, %s931_s15   ;;  %s728_s14 = sphi %s771_s14, %s930_s14   ;;  %s724_s13 = sphi %s769_s13, %s929_s13   ;;  %s720_s12 = sphi %s767_s12, %s928_s12  }
   0x8   : > { %p801_p1 = scmp.eq.s32.totalorder %s454_s18, 0  ;;  %p140_p2 = scmp.lt.s32.totalorder %s740_s17, 3 }
   0x9   : > { %s151_s22 = sshll.u32 %s919_s1, 4  ;;  %s742_s24 = smov [#allocation5]   ;;  %s152_s22 = int_to_ptr.hbm [resolvable:$true] %s151_s22 }
   0xa   : > { %p809_p3 = pnand %p456_p0, %p140_p2  ;;  %s153_s25 = sshll.u32 %s742_s24, 4  ;;  %s154_s25 = int_to_ptr.vmem [resolvable:$true] %s153_s25 }
   0xb   : > { %p459_p6 = scmp.ge.s32.totalorder %s740_s17, 2  ;;  %s168_s28 = sshll.u32 %s920_s2, 4  ;;  %s169_s28 = int_to_ptr.hbm [resolvable:$true] %s168_s28 }
   0xc   : > { %p489_p4 = pneg %p809_p3  ;;  %s743_s29 = smov 128  }
   0xd   : > { %s744_s30 = smov 8   ;;  %s745_s4 = smov [#allocation7]  }
   0xe   : > { %p490_p5 = pnand %p489_p4, %p801_p1  ;;  %s170_s5 = sshll.u32 %s745_s4, 4  ;;  %s171_s5 = int_to_ptr.vmem [resolvable:$true] %s170_s5 }
   0xf   : > { %s455_s6 = sadd.s32 4294967294, %s740_s17   ;;  %s32_s7 = sadd.s32 1, %s736_s16 }
  0x10   : > { %492 = dma.hbm_to_vmem [thread:$0]  (!%p490_p5), %s152_s22, 1024, %s154_s25, [#allocation6], %s743_s29, %s743_s29, %s744_s30  }
  0x11   : > { %495 = dma.hbm_to_vmem [thread:$0]  (!%p490_p5), %s169_s28, 128, %s171_s5, [#allocation6]  }
  0x12   : > { %p34_p7 = scmp.ge.s32.totalorder %s32_s7, 2  ;;  %s41_s8 = sadd.s32 1, %s728_s14 }
  0x13   : > { %p48_p8 = scmp.ne.s32.totalorder %s728_s14, %s724_s13  ;;  %p49_p9 = scmp.eq.s32.totalorder %s740_s17, 0 }
  0x14   : > { %s934_s7 = smov (%p34_p7, %s32_s7), 0  ;;  %p54_p11 = scmp.ne.s32.totalorder %s724_s13, %s720_s12 }
  0x15   : > { %p829_p10 = por %p49_p9, %p48_p8  ;;  %s36_s10 = ssub.s32 %s736_s16, %s934_s7 }
  0x16   : > { %p127_p12 = scmp.eq.s32.totalorder %s454_s18, 1  ;;  %p39_p13 = scmp.eq.s32.totalorder %s36_s10, 0 }
  0x17   : > { %p841_p0 = por %p801_p1, %p54_p11  ;;  %p133_p4 = scmp.eq.s32.totalorder %s455_s6, 1 }
  0x18   : > { %p845_p2 = por %p127_p12, %p48_p8  ;;  %p506_p7 = scmp.lt.s32.totalorder %s740_s17, 2 }
  0x19   : > { %s850_s21 = scalar_select %p39_p13, %s728_s14, %s41_s8  }
  0x1a   : > { %p852_p5 = por %p133_p4, %p54_p11  ;;  %s181_s24 = sand.u32 1, %s728_s14  }
  0x1b   : > { %s188_s26 = scalar_lea.hbm %s918_s0, %s736_s16  ;;  %s184_s28 = scalar_lea.vmem [#allocation2], %s181_s24 }
  0x1c   : > { %s190_s27 = sshll.u32 %s188_s26, 4  ;;  %s192_s29 = sshll.u32 %s184_s28, 4  ;;  %s191_s27 = int_to_ptr.hbm [resolvable:$true] %s190_s27  ;;  %s193_s29 = int_to_ptr.vmem [resolvable:$true] %s192_s29 }
  0x1d   : > { %p497_p8 = pnand %p506_p7, %p829_p10  ;;  %s182_s30 = scalar_lea.sflag [#allocation3], %s181_s24 }
  0x1e   : > { %201 = sbr.rel (%p809_p3) target bundleno = 340 (0x154), region = 32  ;;  %s867_s4 = sand.u32 (!%p809_p3), 1, %s724_s13  }
  0x1f   : > { %499 = dma.hbm_to_vmem [thread:$0]  (!%p497_p8), %s191_s27, 16, %s193_s29, %s182_s30  }
  0x20   : > { %s204_s5 = scalar_lea.sflag (!%p809_p3), [#allocation3], %s867_s4  ;;  %s206_s6 = scalar_lea.vmem (!%p809_p3), [#allocation2], %s867_s4 }
  0x23   : > { %707 = dma.done.wait (%p841_p0), %s204_s5, 16  }
  0x24   : > { %709 = vsyncadd (%p841_p0), %s204_s5, 4294967280 }
  0x25   : > { %711 = dma.done.wait (%p801_p1), [#allocation6], 1152  }
  0x26   : > { %713 = vsyncadd (%p801_p1), [#allocation6], 4294966144  ;;  %v240_v0 = vlaneseq  ;;  %v563_v2 = vld [vmem:[%s206_s6] ss:$0 sm:$0xff]  ;;  %v746_v4 = vmov 0.0   ;;  %v280_v13 = vld [vmem:[#allocation5 + $0x30] sm:$0xff] }
  0x27   : > { %v281_v12 = vld [vmem:[#allocation5 + $0x38] sm:$0xff]  ;;  %v279_v14 = vld [vmem:[#allocation5 + $0x28] sm:$0xff]  ;;  %v278_v15 = vld [vmem:[#allocation5 + $0x20] sm:$0xff]  ;;  %vm315_vm8 = vcmask 523264   ;;  %s463_s19 = sshll.u32 %s867_s4, 3  ;;  %s474_s23 = sshll.u32 %s732_s15, 3 }
  0x28   : > { %v241_v1 = vshrl.u32 %v240_v0, 7  ;;  %327 = vmatpush.msra.mxu0 %v281_v12  ;;  %v277_v18 = vld [vmem:[#allocation5 + $0x18] sm:$0xff]  ;;  %v276_v19 = vld [vmem:[#allocation5 + $0x10] sm:$0xff]  ;;  %v275_v20 = vld [vmem:[#allocation5 + $0x8] sm:$0xff]  ;;  %s352_s10 = scalar_lea.hbm %s921_s3, %s474_s23  ;;  %s238_s11 = scalar_lea.vmem [#allocation8], %s463_s19 }
  0x29   : > { %v274_v21 = vld [vmem:[#allocation5] sm:$0xff]  ;;  %s354_s24 = sshll.u32 %s238_s11, 4  ;;  %s356_s18 = sshll.u32 %s352_s10, 4  ;;  %s355_s24 = int_to_ptr.vmem [resolvable:$true] %s354_s24  ;;  %s357_s18 = int_to_ptr.hbm [resolvable:$true] %s356_s18 }
  0x2a   : > { %vm250_vm0 = vcmp.eq.s32.totalorder %v241_v1, %v563_v2  ;;  %v242_v3 = vadd.s32 8, %v241_v1  ;;  %v243_v7 = vadd.s32 16, %v241_v1  ;;  %v244_v9 = vadd.s32 24, %v241_v1  ;;  %328 = vmatpush.msra.mxu0 %v280_v13  ;;  %v282_v28 = vld [vmem:[#allocation7] sm:$0xff]  ;;  %s341_s25 = scalar_lea.sflag [#allocation4], %s867_s4  ;;  %s668_s26 = sshra.s32 %s357_s18, 4  ;;  %s669_s26 = int_to_ptr.hbm [resolvable:$true] %s668_s26 }
  0x2b   : > { %v464_v5 = vsel %vm250_vm0, 1.0, %v746_v4  ;;  %v245_v11 = vadd.s32 32, %v241_v1  ;;  %v246_v17 = vadd.s32 40, %v241_v1  ;;  %v247_v23 = vadd.s32 48, %v241_v1  ;;  %s670_s27 = scalar_lea.hbm %s669_s26, 8  ;;  %s674_s29 = scalar_lea.hbm %s921_s3, 16 }
  0x2c   : > { %283 = vxpose.xlu0.b32.start [1/8] (short) (narrow) %v464_v5, 8  ;;  %vm251_vm1 = vcmp.eq.s32.totalorder %v242_v3, %v563_v2  ;;  %vm252_vm2 = vcmp.eq.s32.totalorder %v243_v7, %v563_v2  ;;  %vm253_vm3 = vcmp.eq.s32.totalorder %v244_v9, %v563_v2  ;;  %329 = vmatpush.msra.mxu0 %v279_v14  ;;  %v248_v25 = vadd.s32 56, %v241_v1  ;;  %p671_p1 = scmp.ne.s32.totalorder %s669_s26, %s670_s27  ;;  %p675_p10 = scmp.lt.s32.totalorder %s669_s26, %s921_s3 }
  0x2d   : > { %v465_v6 = vsel %vm251_vm1, 1.0, %v746_v4  ;;  %v466_v8 = vsel %vm252_vm2, 1.0, %v746_v4  ;;  %v467_v10 = vsel %vm253_vm3, 1.0, %v746_v4  ;;  %vm254_vm4 = vcmp.eq.s32.totalorder %v245_v11, %v563_v2  ;;  %p676_p11 = scmp.lt.s32.totalorder %s674_s29, %s670_s27 }
  0x2e   : > { %v468_v16 = vsel %vm254_vm4, 1.0, %v746_v4  ;;  %330 = vmatpush.msra.mxu0 %v278_v15  ;;  %vm255_vm5 = vcmp.eq.s32.totalorder %v246_v17, %v563_v2  ;;  %vm256_vm6 = vcmp.eq.s32.totalorder %v247_v23, %v563_v2  ;;  %vm257_vm7 = vcmp.eq.s32.totalorder %v248_v25, %v563_v2  ;;  %p672_p3 = pnand %p671_p1, %p845_p2 }
  0x2f   : > { %v469_v22 = vsel %vm255_vm5, 1.0, %v746_v4  ;;  %v470_v24 = vsel %vm256_vm6, 1.0, %v746_v4  ;;  %v471_v26 = vsel %vm257_vm7, 1.0, %v746_v4  ;;  %p677_p12 = por %p676_p11, %p675_p10 }
  0x30   : > { %331 = vmatpush.msra.mxu0 %v277_v18  ;;  %p673_p9 = pneg %p672_p3 }
  0x32   : > { %332 = vmatpush.msra.mxu0 %v276_v19  ;;  %p678_p13 = pnand %p677_p12, %p673_p9 }
  0x34   : > { %284 = vxpose.xlu0.b32.cont [2/8] (short) (narrow) %v465_v6, 8  ;;  %333 = vmatpush.msra.mxu0 %v275_v20 }
  0x36   : > { %334 = vmatpush.msra.mxu0 %v274_v21 }
  0x3c   : > { %285 = vxpose.xlu0.b32.cont [3/8] (short) (narrow) %v466_v8, 8 }
  0x44   : > { %286 = vxpose.xlu0.b32.cont [4/8] (short) (narrow) %v467_v10, 8 }
  0x4c   : > { %287 = vxpose.xlu0.b32.cont [5/8] (short) (narrow) %v468_v16, 8 }
  0x54   : > { %288 = vxpose.xlu0.b32.cont [6/8] (short) (narrow) %v469_v22, 8 }
  0x5c   : > { %289 = vxpose.xlu0.b32.cont [7/8] (short) (narrow) %v470_v24, 8 }
  0x64   : > { %290 = vxpose.xlu0.b32.end [8/8] (short) (narrow) %v471_v26, 8 }
  0xd0   : > { %v299_v27 = vpop.trf.xlu0 }
  0xd1   : > { %472 = vmatmul.msk.f32.vlgmr.msra.gmra.mxu0 %vm315_vm8, %v299_v27 }
 0x14e   : > { %v336_v29 = vpop.f32.mrf.mxu0 }
 0x14f   : > { %v337_v30 = vadd.f32 %v336_v29, %v282_v28 }
 0x151   : > { %339 = vst [vmem:[%s238_s11] sm:$0xff] %v337_v30 }
 0x152   : > { %681 = shalt.err (!%p678_p13)
}
 0x153   : > { %487 = dma.vmem_to_hbm [thread:$0]  (%p845_p2), %s355_s24, 128, %s357_s18, %s341_s25  }
 0x154 PF: > { %s368_s4 = sand.u32 1, %s720_s12   ;;  %p501_p0 = pnand %p459_p6, %p852_p5 }
 0x155   : > { %s369_s6 = scalar_lea.sflag [#allocation4], %s368_s4 }
 0x156   : > { %p502_p4 = pneg %p501_p0 }
 0x158   : > { %715 = dma.done.wait (%p502_p4), %s369_s6, 128  }
 0x159   : > { %717 = vsyncadd (%p502_p4), %s369_s6, 4294967168  ;;  %s20_s17 = sadd.s32 1, %s740_s17   ;;  %s928_s12 = smov %s724_s13 }
 0x15a   : > { %p17_p7 = scmp.ge.s32.totalorder %s20_s17, 4   ;;  %s929_s13 = smov %s728_s14 }
 0x15b   : > { %s930_s14 = smov %s850_s21  ;;  %s931_s15 = smov %s736_s16 }
 0x15c   : > { %s932_s16 = smov %s934_s7  ;;  %19 = sbr.rel (!%p17_p7) target bundleno = 7 (0x7), region = 86 }
 0x161   :  { %375 = vsyncpa [#allocation3], 1 }
 0x162   :  { %377 = vsyncpa [#allocation3 + $0x1], 1 }
 0x163   :  { %378 = vsyncpa [#allocation6], 1 }
 0x164   :  { %379 = vsyncpa [#allocation4], 1 }
 0x165   :  { %381 = vsyncpa [#allocation4 + $0x1], 1 }

</bundles_post_ra>
